<compile_context>
chip_gen: v6e
topology: v6e:2x2x1
jax: 0.10.0
libtpu: 0.0.40
codegen_flags: <defaults>
</compile_context>

<pallas_src>
import jax
import jax.numpy as jnp
from jax.experimental import pallas as pl
from jax.experimental.pallas import tpu as pltpu

_LANE = 512          # last-dim width: multiple of 128 (lane-dense stores)
_ROWS_PER_TILE = 512 # max rows per block -> 512*512*4B = 1 MiB f32 per block


def _lambda_kernel(x_ref, o_ref):
    # The wrapped `func` — computed entirely on-chip (VPU + EUP).
    # f32 compute (mandatory on v5e: no bf16 VPU/EUP); kernel is HBM-bound so
    # the upcast is free.  HBM traffic stays in the input dtype.
    x = x_ref[...]
    x32 = x.astype(jnp.float32)
    y = x32 * jax.nn.sigmoid(x32)          # func(x) = x * sigmoid(x)
    o_ref[...] = y.astype(o_ref.dtype)


def lambda_forward(x):
    """Apply Lambda(func)(x) where func = x * sigmoid(x), via a Pallas kernel.

    x: array of any float dtype and any shape. Returns same shape/dtype.
    """
    orig_shape = x.shape
    flat = x.reshape(-1)
    total = flat.shape[0]

    # Rows needed at lane width _LANE, rounded up to a multiple of 8 so the
    # sublane dim of every block is (8,128)-aligned.
    m = pl.cdiv(total, _LANE)
    m = pl.cdiv(m, 8) * 8

    # Tile rows: either the whole (small) slab in one block, or fixed-size
    # _ROWS_PER_TILE blocks with M padded up to a multiple of the tile.
    if m <= _ROWS_PER_TILE:
        tm = m
    else:
        tm = _ROWS_PER_TILE
        m = pl.cdiv(m, tm) * tm

    padded_total = m * _LANE
    if padded_total != total:
        flat = jnp.pad(flat, (0, padded_total - total))
    slab = flat.reshape(m, _LANE)

    grid = (m // tm,)
    out_slab = pl.pallas_call(
        _lambda_kernel,
        out_shape=jax.ShapeDtypeStruct(slab.shape, slab.dtype),
        grid_spec=pl.GridSpec(
            grid=grid,
            in_specs=[pl.BlockSpec((tm, _LANE), lambda i: (i, 0))],
            out_specs=pl.BlockSpec((tm, _LANE), lambda i: (i, 0)),
        ),
        compiler_params=pltpu.CompilerParams(
            dimension_semantics=("parallel",),
        ),
    )(slab)

    out_flat = out_slab.reshape(-1)
    if padded_total != total:
        out_flat = out_flat[:total]
    return out_flat.reshape(orig_shape)


if __name__ == "__main__":
    key = jax.random.PRNGKey(0)
    # Small NCHW input consistent with a conv-style module input.
    x = jax.random.normal(key, (2, 4, 16, 16), dtype=jnp.float32)

    y = lambda_forward(x)
    jax.block_until_ready(y)

    # Cross-check against the pure-JAX reference of the wrapped func.
    y_ref = x * jax.nn.sigmoid(x)
    assert y.shape == x.shape and y.dtype == x.dtype
    assert jnp.allclose(y, y_ref, atol=1e-5, rtol=1e-5)

    print("KERNEL_OK")
</pallas_src>

<mosaic_0001>
module attributes {stable_mosaic.version = 11 : i64} {
  func.func @_lambda_kernel(%arg0: i32, %arg1: memref<8x512xf32, #tpu.memory_space<vmem>>, %arg2: memref<8x512xf32, #tpu.memory_space<vmem>>) attributes {dimension_semantics = [#tpu.dimension_semantics<parallel>], iteration_bounds = array<i64: 1>, scalar_prefetch = 0 : i64, scratch_operands = 0 : i64, tpu.core_type = #tpu.core_type<tc>, window_params = [{transform_indices = @transform_0, window_bounds = array<i64: 8, 512>}, {transform_indices = @transform_1, window_bounds = array<i64: 8, 512>}]} {
    %c0 = arith.constant 0 : index
    %c0_0 = arith.constant 0 : index
    %0 = vector.load %arg1[%c0, %c0_0] : memref<8x512xf32, #tpu.memory_space<vmem>>, vector<8x512xf32>
    %1 = arith.negf %0 : vector<8x512xf32>
    %2 = math.exp %1 : vector<8x512xf32>
    %cst = arith.constant 1.000000e+00 : f32
    %3 = vector.broadcast %cst : f32 to vector<8x512xf32>
    %4 = arith.addf %3, %2 : vector<8x512xf32>
    %5 = arith.divf %3, %4 : vector<8x512xf32>
    %6 = arith.mulf %0, %5 : vector<8x512xf32>
    %c0_1 = arith.constant 0 : index
    %c0_2 = arith.constant 0 : index
    %7 = vector.load %arg2[%c0_1, %c0_2] : memref<8x512xf32, #tpu.memory_space<vmem>>, vector<8x512xf32>
    tpu.vector_store %arg2[%c0_1, %c0_2], %6 {strides = array<i32>} : memref<8x512xf32, #tpu.memory_space<vmem>>, vector<8x512xf32>,
    return
  }
  func.func @transform_0(%arg0: i32) -> (i32, i32) {
    %c0_i32 = arith.constant 0 : i32
    %c0_i32_0 = arith.constant 0 : i32
    return %arg0, %c0_i32 : i32, i32
  }
  func.func @transform_1(%arg0: i32) -> (i32, i32) {
    %c0_i32 = arith.constant 0 : i32
    %c0_i32_0 = arith.constant 0 : i32
    return %arg0, %c0_i32 : i32, i32
  }
}

</mosaic_0001>

<bundles_post_ra>
// kernel: tpu_custom_call.1
= control target key start
LH: loop header
LB: loop body
LE: loop exit
PB: predicated region body
PF: predicated region fallthrough
CT: control target
= control target key end

     0   :  { %6 = vsyncpa [#allocation3], 0  ;;  %s156_s0 = inlined_call_operand.hbm [shape: f32[8,512], index: 0, kind: input, shape index: {}]   ;;  %s157_s1 = inlined_call_operand.hbm [shape: f32[8,512], index: 1, kind: output, shape index: {}]  }
   0x1   :  { %7 = vsyncpa [#allocation4], 0  ;;  %s138_s6 = smov [#allocation2]  }
   0x2   :  { %s14_s7 = sshll.u32 %s138_s6, 4  ;;  %s15_s7 = int_to_ptr.vmem [resolvable:$true] %s14_s7 }
   0x3   :  { %s102_s8 = scalar_lea.vmem %s15_s7, 512  ;;  %p107_p1 = scmp.lt.s32.totalorder %s15_s7, %s15_s7 }
   0x4   :  { %p103_p0 = scmp.ne.s32.totalorder %s15_s7, %s102_s8  ;;  %p108_p2 = scmp.lt.s32.totalorder %s102_s8, %s102_s8 }
   0x6   :  { %p109_p3 = por %p108_p2, %p107_p1 }
   0x8   :  { %p110_p4 = pnand %p109_p3, %p103_p0 }
   0xa   :  { %113 = shalt.err (!%p110_p4)
}
   0xb   :  { %17 = dma.hbm_to_vmem [thread:$0]  %s156_s0, 512, %s15_s7, [#allocation3]  }
   0xc   :  { %134 = dma.done.wait [#allocation3], 512  }
   0xd   :  { %135 = vsyncadd [#allocation3], 4294966784  ;;  %v21_v0 = vld [vmem:[#allocation2] sm:$0xff]  ;;  %v22_v1 = vld [vmem:[#allocation2 + $0x8] sm:$0xff]  ;;  %s139_s0 = smov [#allocation5]  }
   0xe   :  { %v23_v2 = vld [vmem:[#allocation2 + $0x10] sm:$0xff]  ;;  %v72_v3 = vmul.f32 -1.442695, %v21_v0  ;;  %v73_v4 = vmul.f32 -1.442695, %v22_v1  ;;  %v24_v6 = vld [vmem:[#allocation2 + $0x18] sm:$0xff] }
   0xf   :  { %v74_v5 = vmul.f32 -1.442695, %v23_v2  ;;  %v75_v7 = vmul.f32 -1.442695, %v24_v6  ;;  %s63_s11 = sshll.u32 %s139_s0, 4  ;;  %s64_s11 = int_to_ptr.vmem [resolvable:$true] %s63_s11 }
  0x10   :  { %78 = vpow2.f32 %v72_v3  ;;  %s114_s12 = scalar_lea.vmem %s64_s11, 512  ;;  %p119_p6 = scmp.lt.s32.totalorder %s64_s11, %s64_s11 }
  0x11   :  { %80 = vpow2.f32 %v73_v4  ;;  %p115_p5 = scmp.ne.s32.totalorder %s64_s11, %s114_s12  ;;  %p120_p7 = scmp.lt.s32.totalorder %s114_s12, %s114_s12 }
  0x12   :  { %82 = vpow2.f32 %v74_v5 }
  0x13   :  { %84 = vpow2.f32 %v75_v7  ;;  %p121_p8 = por %p120_p7, %p119_p6 }
  0x15   :  { %p122_p9 = pnand %p121_p8, %p115_p5 }
  0x1d   :  { %v79_v8 = vpop.eup %78 }
  0x1e   :  { %v81_v9 = vpop.eup %80  ;;  %v37_v10 = vadd.f32 1.0, %v79_v8 }
  0x1f   :  { %v83_v11 = vpop.eup %82  ;;  %v38_v12 = vadd.f32 1.0, %v81_v9 }
  0x20   :  { %v85_v13 = vpop.eup %84  ;;  %86 = vrcp.f32 %v37_v10  ;;  %v39_v14 = vadd.f32 1.0, %v83_v11 }
  0x21   :  { %88 = vrcp.f32 %v38_v12  ;;  %v40_v15 = vadd.f32 1.0, %v85_v13 }
  0x22   :  { %90 = vrcp.f32 %v39_v14 }
  0x23   :  { %92 = vrcp.f32 %v40_v15 }
  0x2d   :  { %v87_v16 = vpop.eup %86 }
  0x2e   :  { %v89_v17 = vpop.eup %88  ;;  %v49_v18 = vmul.f32 %v87_v16, %v21_v0 }
  0x2f   :  { %v91_v19 = vpop.eup %90  ;;  %v50_v20 = vmul.f32 %v89_v17, %v22_v1 }
  0x30   :  { %v93_v21 = vpop.eup %92  ;;  %53 = vst [vmem:[#allocation5] sm:$0xff] %v49_v18  ;;  %v51_v22 = vmul.f32 %v91_v19, %v23_v2 }
  0x31   :  { %54 = vst [vmem:[#allocation5 + $0x8] sm:$0xff] %v50_v20  ;;  %v52_v23 = vmul.f32 %v93_v21, %v24_v6 }
  0x32   :  { %55 = vst [vmem:[#allocation5 + $0x10] sm:$0xff] %v51_v22 }
  0x33   :  { %56 = vst [vmem:[#allocation5 + $0x18] sm:$0xff] %v52_v23 }
  0x34   :  { %125 = shalt.err (!%p122_p9)
}
  0x35   :  { %66 = dma.vmem_to_hbm [thread:$0]  %s64_s11, 512, %s157_s1, [#allocation4]  }
  0x36   :  { %136 = dma.done.wait [#allocation4], 512  }
  0x37   :  { %137 = vsyncadd [#allocation4], 4294966784 }
  0x38   :  { %70 = vsyncpa [#allocation3], 1 }
  0x39   :  { %71 = vsyncpa [#allocation4], 1 }

</bundles_post_ra>
